<compile_context>
chip_gen: v6e
topology: v6e:2x2x1
jax: 0.10.0
libtpu: 0.0.40
codegen_flags: <defaults>
</compile_context>

<pallas_src>
import jax
import jax.numpy as jnp
from jax import lax
from jax.experimental import pallas as pl
from jax.experimental.pallas import tpu as pltpu


def charrnn_kernel(gi_ref, whh_ref, bhh_rz_ref, bhn_ref, wdec_ref, bdec_ref, out_ref):
    # gi_ref   : (T, BB, 3H) f32   precomputed x_t @ W_ih^T + b_ih, gate order r|z|n
    # whh_ref  : (H, 3H)           fused hidden weights (f32 or bf16)
    # bhh_rz   : (1, 3H) f32       [b_hr | b_hz | 0]
    # bhn_ref  : (1, H)  f32       b_hn (must stay inside r * (...))
    # wdec_ref : (H, O_pad)        decoder weight^T, lane-padded
    # bdec_ref : (1, O_pad) f32
    # out_ref  : (BB, O_pad) f32
    T, BB, H3 = gi_ref.shape
    H = H3 // 3
    w_dtype = whh_ref.dtype

    def step(t, h):
        gi = gi_ref[t]                                             # (BB, 3H) f32
        gh = jnp.dot(h.astype(w_dtype), whh_ref[...],
                     preferred_element_type=jnp.float32) + bhh_rz_ref[...]
        r = jax.nn.sigmoid(gi[:, :H] + gh[:, :H])
        z = jax.nn.sigmoid(gi[:, H:2 * H] + gh[:, H:2 * H])
        n = jnp.tanh(gi[:, 2 * H:] + r * (gh[:, 2 * H:] + bhn_ref[...]))
        return (1.0 - z) * n + z * h

    h0 = jnp.zeros((BB, H), jnp.float32)
    h = lax.fori_loop(0, T, step, h0, unroll=True)

    out_ref[...] = (jnp.dot(h.astype(w_dtype), wdec_ref[...],
                            preferred_element_type=jnp.float32) + bdec_ref[...])


def prepare_params(params, weights_dtype=jnp.float32):
    """One-time packing of PyTorch-shaped params into kernel-friendly form."""
    emb, w_ih, w_hh, b_ih, b_hh, w_dec, b_dec = (
        params["emb"], params["w_ih"], params["w_hh"], params["b_ih"],
        params["b_hh"], params["w_dec"], params["b_dec"])
    H = emb.shape[1]
    O = w_dec.shape[0]

    # x @ W_ih^T  ==  x @ w_ih.T ; gate order r|z|n preserved along the 3H axis.
    w_ih_cat = w_ih.T.astype(jnp.float32)                      # (H, 3H)
    w_hh_cat = w_hh.T.astype(weights_dtype)                    # (H, 3H)

    # Per-token input projection with b_ih folded in (vocab is tiny).
    emb_proj = (emb.astype(jnp.float32) @ w_ih_cat
                + b_ih.astype(jnp.float32)[None, :])           # (V, 3H) f32

    # Hidden-side biases: r,z folded into one packed vector; n-gate bias stays separate.
    b_hh_rz = jnp.concatenate(
        [b_hh[:2 * H], jnp.zeros((H,), b_hh.dtype)]).reshape(1, 3 * H).astype(jnp.float32)
    b_hn = b_hh[2 * H:].reshape(1, H).astype(jnp.float32)

    # Decoder, padded to a lane-dense output width (multiple of 128).
    O_pad = max(128, ((O + 127) // 128) * 128)
    w_dec_t = jnp.zeros((H, O_pad), jnp.float32).at[:, :O].set(w_dec.T).astype(weights_dtype)
    b_dec_p = jnp.zeros((1, O_pad), jnp.float32).at[:, :O].set(b_dec)

    return {"emb_proj": emb_proj, "w_hh_cat": w_hh_cat, "b_hh_rz": b_hh_rz,
            "b_hn": b_hn, "w_dec_t": w_dec_t, "b_dec_p": b_dec_p,
            "H": H, "O": O, "O_pad": O_pad}


def charrnn_forward(tokens, packed, *, block_b=512):
    """tokens: (B, T) int32. Returns (B, output_size) float32 logits."""
    H, O, O_pad = packed["H"], packed["O"], packed["O_pad"]
    H3 = 3 * H
    B, T = tokens.shape

    # Glue: gather the precomputed (token -> input-projection) table, time-major so the
    # kernel's per-step index is a trivial leading-dim dynamic load.
    gi = jnp.take(packed["emb_proj"], tokens.T, axis=0)        # (T, B, 3H) f32

    # Pad batch to a sublane multiple of 8 and to a multiple of the batch tile.
    sub = 8
    B_pad = max(sub, -(-B // sub) * sub)
    bb = max(sub, (min(block_b, B_pad) // sub) * sub)
    B_pad = -(-B_pad // bb) * bb
    if B_pad != B:
        gi = jnp.pad(gi, ((0, 0), (0, B_pad - B), (0, 0)))

    grid = (B_pad // bb,)

    # Weights are small and stay VMEM-resident (index_map -> block (0,0)); only gi / out
    # are tiled over batch. TODO(synk): for very large H*T on v7x (64 MiB VMEM), also
    # stream gi over a time grid axis and set vmem_limit_bytes explicitly.
    out = pl.pallas_call(
        charrnn_kernel,
        out_shape=jax.ShapeDtypeStruct((B_pad, O_pad), jnp.float32),
        grid=grid,
        in_specs=[
            pl.BlockSpec((T, bb, H3), lambda i: (0, i, 0)),    # gi tile per batch block
            pl.BlockSpec((H, H3), lambda i: (0, 0)),           # W_hh_cat (resident)
            pl.BlockSpec((1, H3), lambda i: (0, 0)),           # b_hh (r|z|0)
            pl.BlockSpec((1, H), lambda i: (0, 0)),            # b_hn
            pl.BlockSpec((H, O_pad), lambda i: (0, 0)),        # W_dec^T (padded)
            pl.BlockSpec((1, O_pad), lambda i: (0, 0)),        # b_dec (padded)
        ],
        out_specs=pl.BlockSpec((bb, O_pad), lambda i: (i, 0)),
        compiler_params=pltpu.CompilerParams(
            dimension_semantics=("parallel",)),
    )(gi, packed["w_hh_cat"], packed["b_hh_rz"], packed["b_hn"],
      packed["w_dec_t"], packed["b_dec_p"])

    return out[:B, :O]


def make_params(key, input_size, hidden_size, output_size):
    """Deterministic PyTorch-shaped parameters (uniform +-1/sqrt(H), emb ~ N(0,1))."""
    H = hidden_size
    k = jax.random.split(key, 7)
    bound = 1.0 / jnp.sqrt(jnp.float32(H))
    u = lambda kk, shape: jax.random.uniform(kk, shape, jnp.float32, -bound, bound)
    return {
        "emb":   jax.random.normal(k[0], (input_size, H), jnp.float32),
        "w_ih":  u(k[1], (3 * H, H)),
        "w_hh":  u(k[2], (3 * H, H)),
        "b_ih":  u(k[3], (3 * H,)),
        "b_hh":  u(k[4], (3 * H,)),
        "w_dec": u(k[5], (output_size, H)),
        "b_dec": u(k[6], (output_size,)),
    }


def charrnn_reference(tokens, params):
    """Pure-JAX reference mirroring torch.nn.GRU semantics, for validation."""
    emb, w_ih, w_hh, b_ih, b_hh, w_dec, b_dec = (
        params["emb"], params["w_ih"], params["w_hh"], params["b_ih"],
        params["b_hh"], params["w_dec"], params["b_dec"])
    H = emb.shape[1]
    x = jnp.take(emb, tokens, axis=0)            # (B, T, H)
    B, T, _ = x.shape
    h = jnp.zeros((B, H), jnp.float32)
    for t in range(T):
        gi = x[:, t, :] @ w_ih.T + b_ih          # (B, 3H)
        gh = h @ w_hh.T + b_hh
        i_r, i_z, i_n = gi[:, :H], gi[:, H:2 * H], gi[:, 2 * H:]
        h_r, h_z, h_n = gh[:, :H], gh[:, H:2 * H], gh[:, 2 * H:]
        r = jax.nn.sigmoid(i_r + h_r)
        z = jax.nn.sigmoid(i_z + h_z)
        n = jnp.tanh(i_n + r * h_n)
        h = (1.0 - z) * n + z * h
    return h @ w_dec.T + b_dec


if __name__ == "__main__":
    input_size = 16    # vocab size
    hidden_size = 32
    output_size = 16
    B, T = 2, 8

    key = jax.random.PRNGKey(0)
    kp, kt = jax.random.split(key)
    params = make_params(kp, input_size, hidden_size, output_size)
    tokens = jax.random.randint(kt, (B, T), 0, input_size, dtype=jnp.int32)

    ref = charrnn_reference(tokens, params)

    # Exact f32 path (safe on v5e, validates tightly against torch-semantics reference).
    packed_f32 = prepare_params(params, weights_dtype=jnp.float32)
    out = jax.block_until_ready(charrnn_forward(tokens, packed_f32))
    assert out.shape == (B, output_size)
    assert jnp.allclose(out, ref, atol=1e-4, rtol=1e-4)

    # bf16 MXU-operand path (v6e/v7x); elementwise gate math stays f32.
    packed_bf16 = prepare_params(params, weights_dtype=jnp.bfloat16)
    out_bf16 = jax.block_until_ready(charrnn_forward(tokens, packed_bf16))
    assert out_bf16.shape == (B, output_size)
    assert jnp.allclose(out_bf16, ref, atol=5e-2, rtol=5e-2)

    print("KERNEL_OK")
</pallas_src>

<mosaic_0001>
module attributes {stable_mosaic.version = 11 : i64} {
  func.func @charrnn_kernel(%arg0: i32, %arg1: memref<8x8x96xf32, #tpu.memory_space<vmem>>, %arg2: memref<32x96xf32, #tpu.memory_space<vmem>>, %arg3: memref<1x96xf32, #tpu.memory_space<vmem>>, %arg4: memref<1x32xf32, #tpu.memory_space<vmem>>, %arg5: memref<32x128xf32, #tpu.memory_space<vmem>>, %arg6: memref<1x128xf32, #tpu.memory_space<vmem>>, %arg7: memref<8x128xf32, #tpu.memory_space<vmem>>) attributes {dimension_semantics = [#tpu.dimension_semantics<parallel>], iteration_bounds = array<i64: 1>, scalar_prefetch = 0 : i64, scratch_operands = 0 : i64, tpu.core_type = #tpu.core_type<tc>, window_params = [{transform_indices = @transform_0, window_bounds = array<i64: 8, 8, 96>}, {pipeline_mode = #tpu.pipeline_mode<synchronous>, transform_indices = @transform_1, window_bounds = array<i64: 32, 96>}, {pipeline_mode = #tpu.pipeline_mode<synchronous>, transform_indices = @transform_2, window_bounds = array<i64: 1, 96>}, {pipeline_mode = #tpu.pipeline_mode<synchronous>, transform_indices = @transform_3, window_bounds = array<i64: 1, 32>}, {pipeline_mode = #tpu.pipeline_mode<synchronous>, transform_indices = @transform_4, window_bounds = array<i64: 32, 128>}, {pipeline_mode = #tpu.pipeline_mode<synchronous>, transform_indices = @transform_5, window_bounds = array<i64: 1, 128>}, {transform_indices = @transform_6, window_bounds = array<i64: 8, 128>}]} {
    %cst = arith.constant 0.000000e+00 : f32
    %0 = vector.broadcast %cst : f32 to vector<8x32xf32>
    %c0_i32 = arith.constant 0 : i32
    %1 = arith.index_cast %c0_i32 : i32 to index
    %c0 = arith.constant 0 : index
    %c0_0 = arith.constant 0 : index
    %2 = vector.load %arg1[%1, %c0, %c0_0] : memref<8x8x96xf32, #tpu.memory_space<vmem>>, vector<1x8x96xf32>
    %3 = vector.shape_cast %2 : vector<1x8x96xf32> to vector<8x96xf32>
    %c0_1 = arith.constant 0 : index
    %c0_2 = arith.constant 0 : index
    %4 = vector.load %arg2[%c0_1, %c0_2] : memref<32x96xf32, #tpu.memory_space<vmem>>, vector<32x96xf32>
    %cst_3 = arith.constant dense<0.000000e+00> : vector<8x96xf32>
    %5 = tpu.matmul %0, %4, %cst_3 {dimension_numbers = #tpu.dot_dimension_numbers<[1], [0], [0], [1], [0, 0, 1, 1], [], []>} : vector<8x32xf32>, vector<32x96xf32>, vector<8x96xf32> -> vector<8x96xf32>
    %c0_4 = arith.constant 0 : index
    %c0_5 = arith.constant 0 : index
    %6 = vector.load %arg3[%c0_4, %c0_5] : memref<1x96xf32, #tpu.memory_space<vmem>>, vector<1x96xf32>
    %7 = vector.broadcast %6 : vector<1x96xf32> to vector<8x96xf32>
    %8 = arith.addf %5, %7 : vector<8x96xf32>
    %9 = vector.extract_strided_slice %3 {offsets = [0, 0], sizes = [8, 32], strides = [1, 1]} : vector<8x96xf32> to vector<8x32xf32>
    %10 = vector.extract_strided_slice %8 {offsets = [0, 0], sizes = [8, 32], strides = [1, 1]} : vector<8x96xf32> to vector<8x32xf32>
    %11 = arith.addf %9, %10 : vector<8x32xf32>
    %12 = arith.negf %11 : vector<8x32xf32>
    %13 = math.exp %12 : vector<8x32xf32>
    %cst_6 = arith.constant 1.000000e+00 : f32
    %14 = vector.broadcast %cst_6 : f32 to vector<8x32xf32>
    %15 = arith.addf %14, %13 : vector<8x32xf32>
    %16 = arith.divf %14, %15 : vector<8x32xf32>
    %17 = vector.extract_strided_slice %3 {offsets = [0, 32], sizes = [8, 32], strides = [1, 1]} : vector<8x96xf32> to vector<8x32xf32>
    %18 = vector.extract_strided_slice %8 {offsets = [0, 32], sizes = [8, 32], strides = [1, 1]} : vector<8x96xf32> to vector<8x32xf32>
    %19 = arith.addf %17, %18 : vector<8x32xf32>
    %20 = arith.negf %19 : vector<8x32xf32>
    %21 = math.exp %20 : vector<8x32xf32>
    %cst_7 = arith.constant 1.000000e+00 : f32
    %22 = vector.broadcast %cst_7 : f32 to vector<8x32xf32>
    %23 = arith.addf %22, %21 : vector<8x32xf32>
    %24 = arith.divf %22, %23 : vector<8x32xf32>
    %25 = vector.extract_strided_slice %3 {offsets = [0, 64], sizes = [8, 32], strides = [1, 1]} : vector<8x96xf32> to vector<8x32xf32>
    %26 = vector.extract_strided_slice %8 {offsets = [0, 64], sizes = [8, 32], strides = [1, 1]} : vector<8x96xf32> to vector<8x32xf32>
    %c0_8 = arith.constant 0 : index
    %c0_9 = arith.constant 0 : index
    %27 = vector.load %arg4[%c0_8, %c0_9] : memref<1x32xf32, #tpu.memory_space<vmem>>, vector<1x32xf32>
    %28 = vector.broadcast %27 : vector<1x32xf32> to vector<8x32xf32>
    %29 = arith.addf %26, %28 : vector<8x32xf32>
    %30 = arith.mulf %16, %29 : vector<8x32xf32>
    %31 = arith.addf %25, %30 : vector<8x32xf32>
    %32 = math.tanh %31 : vector<8x32xf32>
    %cst_10 = arith.constant 1.000000e+00 : f32
    %33 = vector.broadcast %cst_10 : f32 to vector<8x32xf32>
    %34 = arith.subf %33, %24 : vector<8x32xf32>
    %35 = arith.mulf %34, %32 : vector<8x32xf32>
    %36 = arith.mulf %24, %0 : vector<8x32xf32>
    %37 = arith.addf %35, %36 : vector<8x32xf32>
    %c1_i32 = arith.constant 1 : i32
    %38 = arith.index_cast %c1_i32 : i32 to index
    %c0_11 = arith.constant 0 : index
    %c0_12 = arith.constant 0 : index
    %39 = vector.load %arg1[%38, %c0_11, %c0_12] : memref<8x8x96xf32, #tpu.memory_space<vmem>>, vector<1x8x96xf32>
    %40 = vector.shape_cast %39 : vector<1x8x96xf32> to vector<8x96xf32>
    %c0_13 = arith.constant 0 : index
    %c0_14 = arith.constant 0 : index
    %41 = vector.load %arg2[%c0_13, %c0_14] : memref<32x96xf32, #tpu.memory_space<vmem>>, vector<32x96xf32>
    %cst_15 = arith.constant dense<0.000000e+00> : vector<8x96xf32>
    %42 = tpu.matmul %37, %41, %cst_15 {dimension_numbers = #tpu.dot_dimension_numbers<[1], [0], [0], [1], [0, 0, 1, 1], [], []>} : vector<8x32xf32>, vector<32x96xf32>, vector<8x96xf32> -> vector<8x96xf32>
    %c0_16 = arith.constant 0 : index
    %c0_17 = arith.constant 0 : index
    %43 = vector.load %arg3[%c0_16, %c0_17] : memref<1x96xf32, #tpu.memory_space<vmem>>, vector<1x96xf32>
    %44 = vector.broadcast %43 : vector<1x96xf32> to vector<8x96xf32>
    %45 = arith.addf %42, %44 : vector<8x96xf32>
    %46 = vector.extract_strided_slice %40 {offsets = [0, 0], sizes = [8, 32], strides = [1, 1]} : vector<8x96xf32> to vector<8x32xf32>
    %47 = vector.extract_strided_slice %45 {offsets = [0, 0], sizes = [8, 32], strides = [1, 1]} : vector<8x96xf32> to vector<8x32xf32>
    %48 = arith.addf %46, %47 : vector<8x32xf32>
    %49 = arith.negf %48 : vector<8x32xf32>
    %50 = math.exp %49 : vector<8x32xf32>
    %cst_18 = arith.constant 1.000000e+00 : f32
    %51 = vector.broadcast %cst_18 : f32 to vector<8x32xf32>
    %52 = arith.addf %51, %50 : vector<8x32xf32>
    %53 = arith.divf %51, %52 : vector<8x32xf32>
    %54 = vector.extract_strided_slice %40 {offsets = [0, 32], sizes = [8, 32], strides = [1, 1]} : vector<8x96xf32> to vector<8x32xf32>
    %55 = vector.extract_strided_slice %45 {offsets = [0, 32], sizes = [8, 32], strides = [1, 1]} : vector<8x96xf32> to vector<8x32xf32>
    %56 = arith.addf %54, %55 : vector<8x32xf32>
    %57 = arith.negf %56 : vector<8x32xf32>
    %58 = math.exp %57 : vector<8x32xf32>
    %cst_19 = arith.constant 1.000000e+00 : f32
    %59 = vector.broadcast %cst_19 : f32 to vector<8x32xf32>
    %60 = arith.addf %59, %58 : vector<8x32xf32>
    %61 = arith.divf %59, %60 : vector<8x32xf32>
    %62 = vector.extract_strided_slice %40 {offsets = [0, 64], sizes = [8, 32], strides = [1, 1]} : vector<8x96xf32> to vector<8x32xf32>
    %63 = vector.extract_strided_slice %45 {offsets = [0, 64], sizes = [8, 32], strides = [1, 1]} : vector<8x96xf32> to vector<8x32xf32>
    %c0_20 = arith.constant 0 : index
    %c0_21 = arith.constant 0 : index
    %64 = vector.load %arg4[%c0_20, %c0_21] : memref<1x32xf32, #tpu.memory_space<vmem>>, vector<1x32xf32>
    %65 = vector.broadcast %64 : vector<1x32xf32> to vector<8x32xf32>
    %66 = arith.addf %63, %65 : vector<8x32xf32>
    %67 = arith.mulf %53, %66 : vector<8x32xf32>
    %68 = arith.addf %62, %67 : vector<8x32xf32>
    %69 = math.tanh %68 : vector<8x32xf32>
    %cst_22 = arith.constant 1.000000e+00 : f32
    %70 = vector.broadcast %cst_22 : f32 to vector<8x32xf32>
    %71 = arith.subf %70, %61 : vector<8x32xf32>
    %72 = arith.mulf %71, %69 : vector<8x32xf32>
    %73 = arith.mulf %61, %37 : vector<8x32xf32>
    %74 = arith.addf %72, %73 : vector<8x32xf32>
    %c2_i32 = arith.constant 2 : i32
    %75 = arith.index_cast %c2_i32 : i32 to index
    %c0_23 = arith.constant 0 : index
    %c0_24 = arith.constant 0 : index
    %76 = vector.load %arg1[%75, %c0_23, %c0_24] : memref<8x8x96xf32, #tpu.memory_space<vmem>>, vector<1x8x96xf32>
    %77 = vector.shape_cast %76 : vector<1x8x96xf32> to vector<8x96xf32>
    %c0_25 = arith.constant 0 : index
    %c0_26 = arith.constant 0 : index
    %78 = vector.load %arg2[%c0_25, %c0_26] : memref<32x96xf32, #tpu.memory_space<vmem>>, vector<32x96xf32>
    %cst_27 = arith.constant dense<0.000000e+00> : vector<8x96xf32>
    %79 = tpu.matmul %74, %78, %cst_27 {dimension_numbers = #tpu.dot_dimension_numbers<[1], [0], [0], [1], [0, 0, 1, 1], [], []>} : vector<8x32xf32>, vector<32x96xf32>, vector<8x96xf32> -> vector<8x96xf32>
    %c0_28 = arith.constant 0 : index
    %c0_29 = arith.constant 0 : index
    %80 = vector.load %arg3[%c0_28, %c0_29] : memref<1x96xf32, #tpu.memory_space<vmem>>, vector<1x96xf32>
    %81 = vector.broadcast %80 : vector<1x96xf32> to vector<8x96xf32>
    %82 = arith.addf %79, %81 : vector<8x96xf32>
    %83 = vector.extract_strided_slice %77 {offsets = [0, 0], sizes = [8, 32], strides = [1, 1]} : vector<8x96xf32> to vector<8x32xf32>
    %84 = vector.extract_strided_slice %82 {offsets = [0, 0], sizes = [8, 32], strides = [1, 1]} : vector<8x96xf32> to vector<8x32xf32>
    %85 = arith.addf %83, %84 : vector<8x32xf32>
    %86 = arith.negf %85 : vector<8x32xf32>
    %87 = math.exp %86 : vector<8x32xf32>
    %cst_30 = arith.constant 1.000000e+00 : f32
    %88 = vector.broadcast %cst_30 : f32 to vector<8x32xf32>
    %89 = arith.addf %88, %87 : vector<8x32xf32>
    %90 = arith.divf %88, %89 : vector<8x32xf32>
    %91 = vector.extract_strided_slice %77 {offsets = [0, 32], sizes = [8, 32], strides = [1, 1]} : vector<8x96xf32> to vector<8x32xf32>
    %92 = vector.extract_strided_slice %82 {offsets = [0, 32], sizes = [8, 32], strides = [1, 1]} : vector<8x96xf32> to vector<8x32xf32>
    %93 = arith.addf %91, %92 : vector<8x32xf32>
    %94 = arith.negf %93 : vector<8x32xf32>
    %95 = math.exp %94 : vector<8x32xf32>
    %cst_31 = arith.constant 1.000000e+00 : f32
    %96 = vector.broadcast %cst_31 : f32 to vector<8x32xf32>
    %97 = arith.addf %96, %95 : vector<8x32xf32>
    %98 = arith.divf %96, %97 : vector<8x32xf32>
    %99 = vector.extract_strided_slice %77 {offsets = [0, 64], sizes = [8, 32], strides = [1, 1]} : vector<8x96xf32> to vector<8x32xf32>
    %100 = vector.extract_strided_slice %82 {offsets = [0, 64], sizes = [8, 32], strides = [1, 1]} : vector<8x96xf32> to vector<8x32xf32>
    %c0_32 = arith.constant 0 : index
    %c0_33 = arith.constant 0 : index
    %101 = vector.load %arg4[%c0_32, %c0_33] : memref<1x32xf32, #tpu.memory_space<vmem>>, vector<1x32xf32>
    %102 = vector.broadcast %101 : vector<1x32xf32> to vector<8x32xf32>
    %103 = arith.addf %100, %102 : vector<8x32xf32>
    %104 = arith.mulf %90, %103 : vector<8x32xf32>
    %105 = arith.addf %99, %104 : vector<8x32xf32>
    %106 = math.tanh %105 : vector<8x32xf32>
    %cst_34 = arith.constant 1.000000e+00 : f32
    %107 = vector.broadcast %cst_34 : f32 to vector<8x32xf32>
    %108 = arith.subf %107, %98 : vector<8x32xf32>
    %109 = arith.mulf %108, %106 : vector<8x32xf32>
    %110 = arith.mulf %98, %74 : vector<8x32xf32>
    %111 = arith.addf %109, %110 : vector<8x32xf32>
    %c3_i32 = arith.constant 3 : i32
    %112 = arith.index_cast %c3_i32 : i32 to index
    %c0_35 = arith.constant 0 : index
    %c0_36 = arith.constant 0 : index
    %113 = vector.load %arg1[%112, %c0_35, %c0_36] : memref<8x8x96xf32, #tpu.memory_space<vmem>>, vector<1x8x96xf32>
    %114 = vector.shape_cast %113 : vector<1x8x96xf32> to vector<8x96xf32>
    %c0_37 = arith.constant 0 : index
    %c0_38 = arith.constant 0 : index
    %115 = vector.load %arg2[%c0_37, %c0_38] : memref<32x96xf32, #tpu.memory_space<vmem>>, vector<32x96xf32>
    %cst_39 = arith.constant dense<0.000000e+00> : vector<8x96xf32>
    %116 = tpu.matmul %111, %115, %cst_39 {dimension_numbers = #tpu.dot_dimension_numbers<[1], [0], [0], [1], [0, 0, 1, 1], [], []>} : vector<8x32xf32>, vector<32x96xf32>, vector<8x96xf32> -> vector<8x96xf32>
    %c0_40 = arith.constant 0 : index
    %c0_41 = arith.constant 0 : index
    %117 = vector.load %arg3[%c0_40, %c0_41] : memref<1x96xf32, #tpu.memory_space<vmem>>, vector<1x96xf32>
    %118 = vector.broadcast %117 : vector<1x96xf32> to vector<8x96xf32>
    %119 = arith.addf %116, %118 : vector<8x96xf32>
    %120 = vector.extract_strided_slice %114 {offsets = [0, 0], sizes = [8, 32], strides = [1, 1]} : vector<8x96xf32> to vector<8x32xf32>
    %121 = vector.extract_strided_slice %119 {offsets = [0, 0], sizes = [8, 32], strides = [1, 1]} : vector<8x96xf32> to vector<8x32xf32>
    %122 = arith.addf %120, %121 : vector<8x32xf32>
    %123 = arith.negf %122 : vector<8x32xf32>
    %124 = math.exp %123 : vector<8x32xf32>
    %cst_42 = arith.constant 1.000000e+00 : f32
    %125 = vector.broadcast %cst_42 : f32 to vector<8x32xf32>
    %126 = arith.addf %125, %124 : vector<8x32xf32>
    %127 = arith.divf %125, %126 : vector<8x32xf32>
    %128 = vector.extract_strided_slice %114 {offsets = [0, 32], sizes = [8, 32], strides = [1, 1]} : vector<8x96xf32> to vector<8x32xf32>
    %129 = vector.extract_strided_slice %119 {offsets = [0, 32], sizes = [8, 32], strides = [1, 1]} : vector<8x96xf32> to vector<8x32xf32>
    %130 = arith.addf %128, %129 : vector<8x32xf32>
    %131 = arith.negf %130 : vector<8x32xf32>
    %132 = math.exp %131 : vector<8x32xf32>
    %cst_43 = arith.constant 1.000000e+00 : f32
    %133 = vector.broadcast %cst_43 : f32 to vector<8x32xf32>
    %134 = arith.addf %133, %132 : vector<8x32xf32>
    %135 = arith.divf %133, %134 : vector<8x32xf32>
    %136 = vector.extract_strided_slice %114 {offsets = [0, 64], sizes = [8, 32], strides = [1, 1]} : vector<8x96xf32> to vector<8x32xf32>
    %137 = vector.extract_strided_slice %119 {offsets = [0, 64], sizes = [8, 32], strides = [1, 1]} : vector<8x96xf32> to vector<8x32xf32>
    %c0_44 = arith.constant 0 : index
    %c0_45 = arith.constant 0 : index
    %138 = vector.load %arg4[%c0_44, %c0_45] : memref<1x32xf32, #tpu.memory_space<vmem>>, vector<1x32xf32>
    %139 = vector.broadcast %138 : vector<1x32xf32> to vector<8x32xf32>
    %140 = arith.addf %137, %139 : vector<8x32xf32>
    %141 = arith.mulf %127, %140 : vector<8x32xf32>
    %142 = arith.addf %136, %141 : vector<8x32xf32>
    %143 = math.tanh %142 : vector<8x32xf32>
    %cst_46 = arith.constant 1.000000e+00 : f32
    %144 = vector.broadcast %cst_46 : f32 to vector<8x32xf32>
    %145 = arith.subf %144, %135 : vector<8x32xf32>
    %146 = arith.mulf %145, %143 : vector<8x32xf32>
    %147 = arith.mulf %135, %111 : vector<8x32xf32>
    %148 = arith.addf %146, %147 : vector<8x32xf32>
    %c4_i32 = arith.constant 4 : i32
    %149 = arith.index_cast %c4_i32 : i32 to index
    %c0_47 = arith.constant 0 : index
    %c0_48 = arith.constant 0 : index
    %150 = vector.load %arg1[%149, %c0_47, %c0_48] : memref<8x8x96xf32, #tpu.memory_space<vmem>>, vector<1x8x96xf32>
    %151 = vector.shape_cast %150 : vector<1x8x96xf32> to vector<8x96xf32>
    %c0_49 = arith.constant 0 : index
    %c0_50 = arith.constant 0 : index
    %152 = vector.load %arg2[%c0_49, %c0_50] : memref<32x96xf32, #tpu.memory_space<vmem>>, vector<32x96xf32>
    %cst_51 = arith.constant dense<0.000000e+00> : vector<8x96xf32>
    %153 = tpu.matmul %148, %152, %cst_51 {dimension_numbers = #tpu.dot_dimension_numbers<[1], [0], [0], [1], [0, 0, 1, 1], [], []>} : vector<8x32xf32>, vector<32x96xf32>, vector<8x96xf32> -> vector<8x96xf32>
    %c0_52 = arith.constant 0 : index
    %c0_53 = arith.constant 0 : index
    %154 = vector.load %arg3[%c0_52, %c0_53] : memref<1x96xf32, #tpu.memory_space<vmem>>, vector<1x96xf32>
    %155 = vector.broadcast %154 : vector<1x96xf32> to vector<8x96xf32>
    %156 = arith.addf %153, %155 : vector<8x96xf32>
    %157 = vector.extract_strided_slice %151 {offsets = [0, 0], sizes = [8, 32], strides = [1, 1]} : vector<8x96xf32> to vector<8x32xf32>
    %158 = vector.extract_strided_slice %156 {offsets = [0, 0], sizes = [8, 32], strides = [1, 1]} : vector<8x96xf32> to vector<8x32xf32>
    %159 = arith.addf %157, %158 : vector<8x32xf32>
    %160 = arith.negf %159 : vector<8x32xf32>
    %161 = math.exp %160 : vector<8x32xf32>
    %cst_54 = arith.constant 1.000000e+00 : f32
    %162 = vector.broadcast %cst_54 : f32 to vector<8x32xf32>
    %163 = arith.addf %162, %161 : vector<8x32xf32>
    %164 = arith.divf %162, %163 : vector<8x32xf32>
    %165 = vector.extract_strided_slice %151 {offsets = [0, 32], sizes = [8, 32], strides = [1, 1]} : vector<8x96xf32> to vector<8x32xf32>
    %166 = vector.extract_strided_slice %156 {offsets = [0, 32], sizes = [8, 32], strides = [1, 1]} : vector<8x96xf32> to vector<8x32xf32>
    %167 = arith.addf %165, %166 : vector<8x32xf32>
    %168 = arith.negf %167 : vector<8x32xf32>
    %169 = math.exp %168 : vector<8x32xf32>
    %cst_55 = arith.constant 1.000000e+00 : f32
    %170 = vector.broadcast %cst_55 : f32 to vector<8x32xf32>
    %171 = arith.addf %170, %169 : vector<8x32xf32>
    %172 = arith.divf %170, %171 : vector<8x32xf32>
    %173 = vector.extract_strided_slice %151 {offsets = [0, 64], sizes = [8, 32], strides = [1, 1]} : vector<8x96xf32> to vector<8x32xf32>
    %174 = vector.extract_strided_slice %156 {offsets = [0, 64], sizes = [8, 32], strides = [1, 1]} : vector<8x96xf32> to vector<8x32xf32>
    %c0_56 = arith.constant 0 : index
    %c0_57 = arith.constant 0 : index
    %175 = vector.load %arg4[%c0_56, %c0_57] : memref<1x32xf32, #tpu.memory_space<vmem>>, vector<1x32xf32>
    %176 = vector.broadcast %175 : vector<1x32xf32> to vector<8x32xf32>
    %177 = arith.addf %174, %176 : vector<8x32xf32>
    %178 = arith.mulf %164, %177 : vector<8x32xf32>
    %179 = arith.addf %173, %178 : vector<8x32xf32>
    %180 = math.tanh %179 : vector<8x32xf32>
    %cst_58 = arith.constant 1.000000e+00 : f32
    %181 = vector.broadcast %cst_58 : f32 to vector<8x32xf32>
    %182 = arith.subf %181, %172 : vector<8x32xf32>
    %183 = arith.mulf %182, %180 : vector<8x32xf32>
    %184 = arith.mulf %172, %148 : vector<8x32xf32>
    %185 = arith.addf %183, %184 : vector<8x32xf32>
    %c5_i32 = arith.constant 5 : i32
    %186 = arith.index_cast %c5_i32 : i32 to index
    %c0_59 = arith.constant 0 : index
    %c0_60 = arith.constant 0 : index
    %187 = vector.load %arg1[%186, %c0_59, %c0_60] : memref<8x8x96xf32, #tpu.memory_space<vmem>>, vector<1x8x96xf32>
    %188 = vector.shape_cast %187 : vector<1x8x96xf32> to vector<8x96xf32>
    %c0_61 = arith.constant 0 : index
    %c0_62 = arith.constant 0 : index
    %189 = vector.load %arg2[%c0_61, %c0_62] : memref<32x96xf32, #tpu.memory_space<vmem>>, vector<32x96xf32>
    %cst_63 = arith.constant dense<0.000000e+00> : vector<8x96xf32>
    %190 = tpu.matmul %185, %189, %cst_63 {dimension_numbers = #tpu.dot_dimension_numbers<[1], [0], [0], [1], [0, 0, 1, 1], [], []>} : vector<8x32xf32>, vector<32x96xf32>, vector<8x96xf32> -> vector<8x96xf32>
    %c0_64 = arith.constant 0 : index
    %c0_65 = arith.constant 0 : index
    %191 = vector.load %arg3[%c0_64, %c0_65] : memref<1x96xf32, #tpu.memory_space<vmem>>, vector<1x96xf32>
    %192 = vector.broadcast %191 : vector<1x96xf32> to vector<8x96xf32>
    %193 = arith.addf %190, %192 : vector<8x96xf32>
    %194 = vector.extract_strided_slice %188 {offsets = [0, 0], sizes = [8, 32], strides = [1, 1]} : vector<8x96xf32> to vector<8x32xf32>
    %195 = vector.extract_strided_slice %193 {offsets = [0, 0], sizes = [8, 32], strides = [1, 1]} : vector<8x96xf32> to vector<8x32xf32>
    %196 = arith.addf %194, %195 : vector<8x32xf32>
    %197 = arith.negf %196 : vector<8x32xf32>
    %198 = math.exp %197 : vector<8x32xf32>
    %cst_66 = arith.constant 1.000000e+00 : f32
    %199 = vector.broadcast %cst_66 : f32 to vector<8x32xf32>
    %200 = arith.addf %199, %198 : vector<8x32xf32>
    %201 = arith.divf %199, %200 : vector<8x32xf32>
    %202 = vector.extract_strided_slice %188 {offsets = [0, 32], sizes = [8, 32], strides = [1, 1]} : vector<8x96xf32> to vector<8x32xf32>
    %203 = vector.extract_strided_slice %193 {offsets = [0, 32], sizes = [8, 32], strides = [1, 1]} : vector<8x96xf32> to vector<8x32xf32>
    %204 = arith.addf %202, %203 : vector<8x32xf32>
    %205 = arith.negf %204 : vector<8x32xf32>
    %206 = math.exp %205 : vector<8x32xf32>
    %cst_67 = arith.constant 1.000000e+00 : f32
    %207 = vector.broadcast %cst_67 : f32 to vector<8x32xf32>
    %208 = arith.addf %207, %206 : vector<8x32xf32>
    %209 = arith.divf %207, %208 : vector<8x32xf32>
    %210 = vector.extract_strided_slice %188 {offsets = [0, 64], sizes = [8, 32], strides = [1, 1]} : vector<8x96xf32> to vector<8x32xf32>
    %211 = vector.extract_strided_slice %193 {offsets = [0, 64], sizes = [8, 32], strides = [1, 1]} : vector<8x96xf32> to vector<8x32xf32>
    %c0_68 = arith.constant 0 : index
    %c0_69 = arith.constant 0 : index
    %212 = vector.load %arg4[%c0_68, %c0_69] : memref<1x32xf32, #tpu.memory_space<vmem>>, vector<1x32xf32>
    %213 = vector.broadcast %212 : vector<1x32xf32> to vector<8x32xf32>
    %214 = arith.addf %211, %213 : vector<8x32xf32>
    %215 = arith.mulf %201, %214 : vector<8x32xf32>
    %216 = arith.addf %210, %215 : vector<8x32xf32>
    %217 = math.tanh %216 : vector<8x32xf32>
    %cst_70 = arith.constant 1.000000e+00 : f32
    %218 = vector.broadcast %cst_70 : f32 to vector<8x32xf32>
    %219 = arith.subf %218, %209 : vector<8x32xf32>
    %220 = arith.mulf %219, %217 : vector<8x32xf32>
    %221 = arith.mulf %209, %185 : vector<8x32xf32>
    %222 = arith.addf %220, %221 : vector<8x32xf32>
    %c6_i32 = arith.constant 6 : i32
    %223 = arith.index_cast %c6_i32 : i32 to index
    %c0_71 = arith.constant 0 : index
    %c0_72 = arith.constant 0 : index
    %224 = vector.load %arg1[%223, %c0_71, %c0_72] : memref<8x8x96xf32, #tpu.memory_space<vmem>>, vector<1x8x96xf32>
    %225 = vector.shape_cast %224 : vector<1x8x96xf32> to vector<8x96xf32>
    %c0_73 = arith.constant 0 : index
    %c0_74 = arith.constant 0 : index
    %226 = vector.load %arg2[%c0_73, %c0_74] : memref<32x96xf32, #tpu.memory_space<vmem>>, vector<32x96xf32>
    %cst_75 = arith.constant dense<0.000000e+00> : vector<8x96xf32>
    %227 = tpu.matmul %222, %226, %cst_75 {dimension_numbers = #tpu.dot_dimension_numbers<[1], [0], [0], [1], [0, 0, 1, 1], [], []>} : vector<8x32xf32>, vector<32x96xf32>, vector<8x96xf32> -> vector<8x96xf32>
    %c0_76 = arith.constant 0 : index
    %c0_77 = arith.constant 0 : index
    %228 = vector.load %arg3[%c0_76, %c0_77] : memref<1x96xf32, #tpu.memory_space<vmem>>, vector<1x96xf32>
    %229 = vector.broadcast %228 : vector<1x96xf32> to vector<8x96xf32>
    %230 = arith.addf %227, %229 : vector<8x96xf32>
    %231 = vector.extract_strided_slice %225 {offsets = [0, 0], sizes = [8, 32], strides = [1, 1]} : vector<8x96xf32> to vector<8x32xf32>
    %232 = vector.extract_strided_slice %230 {offsets = [0, 0], sizes = [8, 32], strides = [1, 1]} : vector<8x96xf32> to vector<8x32xf32>
    %233 = arith.addf %231, %232 : vector<8x32xf32>
    %234 = arith.negf %233 : vector<8x32xf32>
    %235 = math.exp %234 : vector<8x32xf32>
    %cst_78 = arith.constant 1.000000e+00 : f32
    %236 = vector.broadcast %cst_78 : f32 to vector<8x32xf32>
    %237 = arith.addf %236, %235 : vector<8x32xf32>
    %238 = arith.divf %236, %237 : vector<8x32xf32>
    %239 = vector.extract_strided_slice %225 {offsets = [0, 32], sizes = [8, 32], strides = [1, 1]} : vector<8x96xf32> to vector<8x32xf32>
    %240 = vector.extract_strided_slice %230 {offsets = [0, 32], sizes = [8, 32], strides = [1, 1]} : vector<8x96xf32> to vector<8x32xf32>
    %241 = arith.addf %239, %240 : vector<8x32xf32>
    %242 = arith.negf %241 : vector<8x32xf32>
    %243 = math.exp %242 : vector<8x32xf32>
    %cst_79 = arith.constant 1.000000e+00 : f32
    %244 = vector.broadcast %cst_79 : f32 to vector<8x32xf32>
    %245 = arith.addf %244, %243 : vector<8x32xf32>
    %246 = arith.divf %244, %245 : vector<8x32xf32>
    %247 = vector.extract_strided_slice %225 {offsets = [0, 64], sizes = [8, 32], strides = [1, 1]} : vector<8x96xf32> to vector<8x32xf32>
    %248 = vector.extract_strided_slice %230 {offsets = [0, 64], sizes = [8, 32], strides = [1, 1]} : vector<8x96xf32> to vector<8x32xf32>
    %c0_80 = arith.constant 0 : index
    %c0_81 = arith.constant 0 : index
    %249 = vector.load %arg4[%c0_80, %c0_81] : memref<1x32xf32, #tpu.memory_space<vmem>>, vector<1x32xf32>
    %250 = vector.broadcast %249 : vector<1x32xf32> to vector<8x32xf32>
    %251 = arith.addf %248, %250 : vector<8x32xf32>
    %252 = arith.mulf %238, %251 : vector<8x32xf32>
    %253 = arith.addf %247, %252 : vector<8x32xf32>
    %254 = math.tanh %253 : vector<8x32xf32>
    %cst_82 = arith.constant 1.000000e+00 : f32
    %255 = vector.broadcast %cst_82 : f32 to vector<8x32xf32>
    %256 = arith.subf %255, %246 : vector<8x32xf32>
    %257 = arith.mulf %256, %254 : vector<8x32xf32>
    %258 = arith.mulf %246, %222 : vector<8x32xf32>
    %259 = arith.addf %257, %258 : vector<8x32xf32>
    %c7_i32 = arith.constant 7 : i32
    %260 = arith.index_cast %c7_i32 : i32 to index
    %c0_83 = arith.constant 0 : index
    %c0_84 = arith.constant 0 : index
    %261 = vector.load %arg1[%260, %c0_83, %c0_84] : memref<8x8x96xf32, #tpu.memory_space<vmem>>, vector<1x8x96xf32>
    %262 = vector.shape_cast %261 : vector<1x8x96xf32> to vector<8x96xf32>
    %c0_85 = arith.constant 0 : index
    %c0_86 = arith.constant 0 : index
    %263 = vector.load %arg2[%c0_85, %c0_86] : memref<32x96xf32, #tpu.memory_space<vmem>>, vector<32x96xf32>
    %cst_87 = arith.constant dense<0.000000e+00> : vector<8x96xf32>
    %264 = tpu.matmul %259, %263, %cst_87 {dimension_numbers = #tpu.dot_dimension_numbers<[1], [0], [0], [1], [0, 0, 1, 1], [], []>} : vector<8x32xf32>, vector<32x96xf32>, vector<8x96xf32> -> vector<8x96xf32>
    %c0_88 = arith.constant 0 : index
    %c0_89 = arith.constant 0 : index
    %265 = vector.load %arg3[%c0_88, %c0_89] : memref<1x96xf32, #tpu.memory_space<vmem>>, vector<1x96xf32>
    %266 = vector.broadcast %265 : vector<1x96xf32> to vector<8x96xf32>
    %267 = arith.addf %264, %266 : vector<8x96xf32>
    %268 = vector.extract_strided_slice %262 {offsets = [0, 0], sizes = [8, 32], strides = [1, 1]} : vector<8x96xf32> to vector<8x32xf32>
    %269 = vector.extract_strided_slice %267 {offsets = [0, 0], sizes = [8, 32], strides = [1, 1]} : vector<8x96xf32> to vector<8x32xf32>
    %270 = arith.addf %268, %269 : vector<8x32xf32>
    %271 = arith.negf %270 : vector<8x32xf32>
    %272 = math.exp %271 : vector<8x32xf32>
    %cst_90 = arith.constant 1.000000e+00 : f32
    %273 = vector.broadcast %cst_90 : f32 to vector<8x32xf32>
    %274 = arith.addf %273, %272 : vector<8x32xf32>
    %275 = arith.divf %273, %274 : vector<8x32xf32>
    %276 = vector.extract_strided_slice %262 {offsets = [0, 32], sizes = [8, 32], strides = [1, 1]} : vector<8x96xf32> to vector<8x32xf32>
    %277 = vector.extract_strided_slice %267 {offsets = [0, 32], sizes = [8, 32], strides = [1, 1]} : vector<8x96xf32> to vector<8x32xf32>
    %278 = arith.addf %276, %277 : vector<8x32xf32>
    %279 = arith.negf %278 : vector<8x32xf32>
    %280 = math.exp %279 : vector<8x32xf32>
    %cst_91 = arith.constant 1.000000e+00 : f32
    %281 = vector.broadcast %cst_91 : f32 to vector<8x32xf32>
    %282 = arith.addf %281, %280 : vector<8x32xf32>
    %283 = arith.divf %281, %282 : vector<8x32xf32>
    %284 = vector.extract_strided_slice %262 {offsets = [0, 64], sizes = [8, 32], strides = [1, 1]} : vector<8x96xf32> to vector<8x32xf32>
    %285 = vector.extract_strided_slice %267 {offsets = [0, 64], sizes = [8, 32], strides = [1, 1]} : vector<8x96xf32> to vector<8x32xf32>
    %c0_92 = arith.constant 0 : index
    %c0_93 = arith.constant 0 : index
    %286 = vector.load %arg4[%c0_92, %c0_93] : memref<1x32xf32, #tpu.memory_space<vmem>>, vector<1x32xf32>
    %287 = vector.broadcast %286 : vector<1x32xf32> to vector<8x32xf32>
    %288 = arith.addf %285, %287 : vector<8x32xf32>
    %289 = arith.mulf %275, %288 : vector<8x32xf32>
    %290 = arith.addf %284, %289 : vector<8x32xf32>
    %291 = math.tanh %290 : vector<8x32xf32>
    %cst_94 = arith.constant 1.000000e+00 : f32
    %292 = vector.broadcast %cst_94 : f32 to vector<8x32xf32>
    %293 = arith.subf %292, %283 : vector<8x32xf32>
    %294 = arith.mulf %293, %291 : vector<8x32xf32>
    %295 = arith.mulf %283, %259 : vector<8x32xf32>
    %296 = arith.addf %294, %295 : vector<8x32xf32>
    %c8_i32 = arith.constant 8 : i32
    %c0_95 = arith.constant 0 : index
    %c0_96 = arith.constant 0 : index
    %297 = vector.load %arg5[%c0_95, %c0_96] : memref<32x128xf32, #tpu.memory_space<vmem>>, vector<32x128xf32>
    %cst_97 = arith.constant dense<0.000000e+00> : vector<8x128xf32>
    %298 = tpu.matmul %296, %297, %cst_97 {dimension_numbers = #tpu.dot_dimension_numbers<[1], [0], [0], [1], [0, 0, 1, 1], [], []>} : vector<8x32xf32>, vector<32x128xf32>, vector<8x128xf32> -> vector<8x128xf32>
    %c0_98 = arith.constant 0 : index
    %c0_99 = arith.constant 0 : index
    %299 = vector.load %arg6[%c0_98, %c0_99] : memref<1x128xf32, #tpu.memory_space<vmem>>, vector<1x128xf32>
    %300 = vector.broadcast %299 : vector<1x128xf32> to vector<8x128xf32>
    %301 = arith.addf %298, %300 : vector<8x128xf32>
    %c0_100 = arith.constant 0 : index
    %c0_101 = arith.constant 0 : index
    %302 = vector.load %arg7[%c0_100, %c0_101] : memref<8x128xf32, #tpu.memory_space<vmem>>, vector<8x128xf32>
    tpu.vector_store %arg7[%c0_100, %c0_101], %301 {strides = array<i32>} : memref<8x128xf32, #tpu.memory_space<vmem>>, vector<8x128xf32>,
    return
  }
  func.func @transform_0(%arg0: i32) -> (i32, i32, i32) {
    %c0_i32 = arith.constant 0 : i32
    %c0_i32_0 = arith.constant 0 : i32
    %c0_i32_1 = arith.constant 0 : i32
    return %c0_i32, %arg0, %c0_i32_0 : i32, i32, i32
  }
  func.func @transform_1(%arg0: i32) -> (i32, i32) {
    %c0_i32 = arith.constant 0 : i32
    %c0_i32_0 = arith.constant 0 : i32
    %c0_i32_1 = arith.constant 0 : i32
    return %c0_i32, %c0_i32_0 : i32, i32
  }
  func.func @transform_2(%arg0: i32) -> (i32, i32) {
    %c0_i32 = arith.constant 0 : i32
    %c0_i32_0 = arith.constant 0 : i32
    %c0_i32_1 = arith.constant 0 : i32
    return %c0_i32, %c0_i32_0 : i32, i32
  }
  func.func @transform_3(%arg0: i32) -> (i32, i32) {
    %c0_i32 = arith.constant 0 : i32
    %c0_i32_0 = arith.constant 0 : i32
    %c0_i32_1 = arith.constant 0 : i32
    return %c0_i32, %c0_i32_0 : i32, i32
  }
  func.func @transform_4(%arg0: i32) -> (i32, i32) {
    %c0_i32 = arith.constant 0 : i32
    %c0_i32_0 = arith.constant 0 : i32
    %c0_i32_1 = arith.constant 0 : i32
    return %c0_i32, %c0_i32_0 : i32, i32
  }
  func.func @transform_5(%arg0: i32) -> (i32, i32) {
    %c0_i32 = arith.constant 0 : i32
    %c0_i32_0 = arith.constant 0 : i32
    %c0_i32_1 = arith.constant 0 : i32
    return %c0_i32, %c0_i32_0 : i32, i32
  }
  func.func @transform_6(%arg0: i32) -> (i32, i32) {
    %c0_i32 = arith.constant 0 : i32
    %c0_i32_0 = arith.constant 0 : i32
    return %arg0, %c0_i32 : i32, i32
  }
}

</mosaic_0001>

<bundles_post_ra>
// kernel: tpu_custom_call.1
= control target key start
LH: loop header
LB: loop body
LE: loop exit
PB: predicated region body
PF: predicated region fallthrough
CT: control target
= control target key end

     0   :  { %11 = vsyncpa [#allocation3], 0  ;;  %s1547_s0 = inlined_call_operand.hbm [shape: f32[8,8,96], index: 0, kind: input, shape index: {}]   ;;  %s1548_s1 = inlined_call_operand.hbm [shape: f32[32,96], index: 1, kind: input, shape index: {}]   ;;  %s1549_s2 = inlined_call_operand.vmem [shape: f32[1,96], index: 2, kind: input, shape index: {}]   ;;  %s1550_s3 = inlined_call_operand.vmem [shape: f32[1,32], index: 3, kind: input, shape index: {}]   ;;  %s1551_s4 = inlined_call_operand.hbm [shape: f32[32,128], index: 4, kind: input, shape index: {}]   ;;  %s1552_s5 = inlined_call_operand.vmem [shape: f32[1,128], index: 5, kind: input, shape index: {}]   ;;  %s1553_s6 = inlined_call_operand.hbm [shape: f32[8,128], index: 6, kind: output, shape index: {}]  }
   0x1   :  { %12 = vsyncpa [#allocation6], 0 }
   0x2   :  { %13 = vsyncpa [#allocation4], 0  ;;  %s1325_s21 = smov [#allocation5]   ;;  %s1326_s23 = smov [#allocation2]  }
   0x3   :  { %s31_s22 = sshll.u32 %s1325_s21, 4  ;;  %s19_s24 = sshll.u32 %s1326_s23, 4  ;;  %s32_s22 = int_to_ptr.vmem [resolvable:$true] %s31_s22  ;;  %s20_s24 = int_to_ptr.vmem [resolvable:$true] %s19_s24 }
   0x4   :  { %s1247_s25 = scalar_lea.vmem %s32_s22, 512  ;;  %p1252_p1 = scmp.lt.s32.totalorder %s32_s22, %s32_s22 }
   0x5   :  { %p1248_p0 = scmp.ne.s32.totalorder %s32_s22, %s1247_s25  ;;  %p1253_p2 = scmp.lt.s32.totalorder %s1247_s25, %s1247_s25 }
   0x7   :  { %p1254_p3 = por %p1253_p2, %p1252_p1 }
   0x9   :  { %p1255_p4 = pnand %p1254_p3, %p1248_p0 }
   0xb   :  { %1258 = shalt.err (!%p1255_p4)
}
   0xc   :  { %s1327_s26 = smov 128   ;;  %s1328_s27 = smov 8  }
   0xd   :  { %37 = dma.hbm_to_vmem [thread:$0]  %s1548_s1, 512, %s32_s22, [#allocation6], %s1327_s26, %s1327_s26, %s1328_s27  }
   0xe   :  { %s1267_s30 = scalar_lea.vmem %s20_s24, 1024  ;;  %p1272_p6 = scmp.lt.s32.totalorder %s20_s24, %s20_s24 }
   0xf   :  { %p1268_p5 = scmp.ne.s32.totalorder %s20_s24, %s1267_s30  ;;  %p1273_p7 = scmp.lt.s32.totalorder %s1267_s30, %s1267_s30 }
  0x11   :  { %p1274_p8 = por %p1273_p7, %p1272_p6 }
  0x13   :  { %p1275_p9 = pnand %p1274_p8, %p1268_p5 }
  0x15   :  { %1278 = shalt.err (!%p1275_p9)
}
  0x16   :  { %25 = dma.hbm_to_vmem [thread:$0]  %s1547_s0, 1024, %s20_s24, [#allocation3], %s1327_s26, %s1327_s26, %s1328_s27  }
  0x17   :  { %s1329_s9 = smov [#allocation7]  }
  0x18   :  { %s47_s10 = sshll.u32 %s1329_s9, 4  ;;  %s48_s10 = int_to_ptr.vmem [resolvable:$true] %s47_s10 }
  0x19   :  { %s1287_s11 = scalar_lea.vmem %s48_s10, 512  ;;  %p1292_p11 = scmp.lt.s32.totalorder %s48_s10, %s48_s10 }
  0x1a   :  { %p1288_p10 = scmp.ne.s32.totalorder %s48_s10, %s1287_s11  ;;  %p1293_p12 = scmp.lt.s32.totalorder %s1287_s11, %s1287_s11 }
  0x1c   :  { %p1294_p13 = por %p1293_p12, %p1292_p11 }
  0x1e   :  { %p1295_p0 = pnand %p1294_p13, %p1288_p10 }
  0x20   :  { %1298 = shalt.err (!%p1295_p0)
}
  0x21   :  { %53 = dma.hbm_to_vmem [thread:$0]  %s1551_s4, 512, %s48_s10, [#allocation6], %s1327_s26, %s1327_s26, %s1328_s27  }
  0x22   :  { %1319 = dma.done.wait [#allocation3], 1024  }
  0x23   :  { %1320 = vsyncadd [#allocation3], 4294966272 }
  0x24   :  { %1321 = dma.done.wait [#allocation6], 1024  }
  0x25   :  { %1322 = vsyncadd [#allocation6], 4294966272  ;;  %v1330_v0 = vmov 0.0   ;;  %vm1331_vm0 = vmmov 0   ;;  %v1385_v1 = vld [vmem:[#allocation5 + $0x18] sm:$0xff]  ;;  %v1387_v2 = vld [vmem:[#allocation5 + $0x10] sm:$0xff] }
  0x26   :  { %1082 = vmatprep.subr.mxu0 %v1330_v0  ;;  %1090 = vmatprep.mubr.msk.f32.mxu0 %vm1331_vm0, %v1330_v0  ;;  %v1020_v3 = vld [vmem:[%s1550_s3] ss:$0 sm:$0xff]  ;;  %v1395_v4 = vld [vmem:[#allocation5 + $0x8] sm:$0xff]  ;;  %s1332_s13 = smov 64   ;;  %vm77_vm1 = vcmask 261120   ;;  %v292_v54 = vld [vmem:[#allocation2 + $0x10] sm:$0xff] }
  0x27   :  { %1093 = vmatprep.subr.mxu1 %v1330_v0  ;;  %1101 = vmatprep.mubr.msk.f32.mxu1 %vm1331_vm0, %v1330_v0  ;;  %v1401_v5 = vld [vmem:[#allocation5] sm:$0xff]  ;;  %v188_v33 = vld [vmem:[#allocation2 + $0x8] sm:$0xff]  ;;  %s1334_s17 = smov [#allocation8]  }
  0x28   :  { %1083 = vmatpush3.msra.mxu0 %v1385_v1  ;;  %1094 = vmatpush3.msra.mxu1 %v1385_v1  ;;  %v1427_v6 = vld [vmem:[%s1549_s2] ss:$0 sm:$0xff]  ;;  %s1333_s2 = smov 96   ;;  %s1008_s18 = sshll.u32 %s1334_s17, 4  ;;  %s1009_s18 = int_to_ptr.vmem [resolvable:$true] %s1008_s18 }
  0x29   :  { %1084 = vmatprep.subr.mxu0 %v1330_v0  ;;  %164 = vrot.lane.b32.xlu0 %v1020_v3, %s1332_s13  ;;  %v65_v12 = vld [vmem:[#allocation2] sm:$0xff]  ;;  %s1299_s19 = scalar_lea.vmem %s1009_s18, 128  ;;  %p1304_p2 = scmp.lt.s32.totalorder %s1009_s18, %s1009_s18 }
  0x2a   :  { %1085 = vmatpush3.msra.mxu0 %v1387_v2  ;;  %1095 = vmatprep.subr.mxu1 %v1330_v0  ;;  %p1300_p1 = scmp.ne.s32.totalorder %s1009_s18, %s1299_s19  ;;  %p1305_p3 = scmp.lt.s32.totalorder %s1299_s19, %s1299_s19 }
  0x2b   :  { %1086 = vmatprep.subr.mxu0 %v1330_v0  ;;  %1096 = vmatpush3.msra.mxu1 %v1387_v2 }
  0x2c   :  { %1087 = vmatpush3.msra.mxu0 %v1395_v4  ;;  %1097 = vmatprep.subr.mxu1 %v1330_v0  ;;  %p1306_p4 = por %p1305_p3, %p1304_p2 }
  0x2d   :  { %1088 = vmatprep.subr.mxu0 %v1330_v0  ;;  %1098 = vmatpush3.msra.mxu1 %v1395_v4 }
  0x2e   :  { %1089 = vmatpush3.msra.mxu0 %v1401_v5  ;;  %1099 = vmatprep.subr.mxu1 %v1330_v0  ;;  %p1307_p5 = pnand %p1306_p4, %p1300_p1 }
  0x2f   :  { %1091 = vmatmul.mubr.f32.vlgmr.msra.gmra.mxu0 %v1330_v0  ;;  %1100 = vmatpush3.msra.mxu1 %v1401_v5 }
  0x30   :  { %1104 = vmatprep.subr.mxu0 %v1330_v0  ;;  %1112 = vmatprep.mubr.msk.f32.mxu0 %vm1331_vm0, %v1330_v0 }
  0x31   :  { %1105 = vmatpush3.msra.mxu0 %v1385_v1  ;;  %1115 = vmatprep.subr.mxu1 %v1330_v0 }
  0x32   :  { %1106 = vmatprep.subr.mxu0 %v1330_v0 }
  0x33   :  { %1107 = vmatpush3.msra.mxu0 %v1387_v2 }
  0x34   :  { %1108 = vmatprep.subr.mxu0 %v1330_v0 }
  0x35   :  { %1109 = vmatpush3.msra.mxu0 %v1395_v4 }
  0x36   :  { %1110 = vmatprep.subr.mxu0 %v1330_v0 }
  0x37   :  { %1111 = vmatpush3.msra.mxu0 %v1401_v5 }
  0x38   :  { %1126 = vmatprep.subr.mxu0 %v1330_v0 }
  0x9b   :  { %v1429_v8 = vpop.permute.xlu0 %164 }
  0xef   :  { %v147_v7 = vpop.f32.mrf.mxu0 }
  0xf0   :  { %v148_v9 = vadd.f32 %v1427_v6, %v147_v7 }
  0xf1   :  { %v1092_v10 = vpop.f32.mrf.mxu0 }
  0xf2   :  { %v167_v11 = vadd.f32 %v1429_v8, %v148_v9  ;;  %v151_v13 = vadd.f32 %v148_v9, %v65_v12 }
  0xf4   :  { %169 = vrot.lane.b32.xlu0 %v167_v11, %s1332_s13  ;;  %v1019_v14 = vmul.f32 -1.442695, %v151_v13 }
  0xf6   :  { %1191 = vpow2.f32 %v1019_v14 }
 0x103   :  { %v1192_v15 = vpop.eup %1191 }
 0x104   :  { %v155_v16 = vadd.f32 1.0, %v1192_v15 }
 0x106   :  { %1193 = vrcp.f32 %v155_v16 }
 0x113   :  { %v1194_v17 = vpop.eup %1193 }
 0x114   :  { %v179_v23 = vsub.f32 1.0, %v1194_v17  ;;  %v185_v25 = vmul.f32 0.0, %v1194_v17 }
 0x166   :  { %v170_v18 = vpop.permute.xlu0 %169 }
 0x167   :  { %v172_v19 = vmul.f32 %v1194_v17, %v170_v18  ;;  %v396_v18 = vld [vmem:[#allocation2 + $0x18] sm:$0xff] }
 0x169   :  { %174 = vrot.lane.b32.xlu1 %v172_v19, %s1332_s13 }
 0x1db   :  { %v175_v20 = vpop.permute.xlu1 %174 }
 0x1dc   :  { %v177_v21 = vadd.f32 %v175_v20, %v65_v12 }
 0x1de   :  { %1195 = vtanh.f32 %v177_v21 }
 0x1eb   :  { %v1196_v22 = vpop.eup %1195 }
 0x1ec   :  { %181 = vrot.lane.b32.xlu1 %v1196_v22, %s1333_s2 }
 0x25e   :  { %v182_v24 = vpop.permute.xlu1 %181 }
 0x25f   :  { %v184_v26 = vmul.f32 %v182_v24, %v179_v23 }
 0x261   :  { %v186_v27 = vadd.f32 %v185_v25, %v184_v26 }
 0x263   :  { %190 = vrot.lane.b32.xlu0 %v186_v27, %s1333_s2 }
 0x2d5   :  { %v191_v28 = vpop.permute.xlu0 %190 }
 0x2d6   :  { %1102 = vmatmul.mubr.msk.f32.vlgmr.msra.gmra.mxu1 %vm77_vm1, %v191_v28 }
 0x2d7   :  { %1116 = vmatpush3.msra.mxu1 %v1385_v1  ;;  %1123 = vmatprep.mubr.msk.f32.mxu1 %vm1331_vm0, %v1330_v0 }
 0x2d8   :  { %1117 = vmatprep.subr.mxu1 %v1330_v0 }
 0x2d9   :  { %1118 = vmatpush3.msra.mxu1 %v1387_v2 }
 0x2da   :  { %1119 = vmatprep.subr.mxu1 %v1330_v0 }
 0x2db   :  { %1120 = vmatpush3.msra.mxu1 %v1395_v4 }
 0x2dc   :  { %1121 = vmatprep.subr.mxu1 %v1330_v0 }
 0x2dd   :  { %1122 = vmatpush3.msra.mxu1 %v1401_v5 }
 0x2de   :  { %1137 = vmatprep.subr.mxu1 %v1330_v0 }
 0x396   :  { %v260_v29 = vpop.f32.mrf.mxu1 }
 0x397   :  { %v261_v30 = vadd.f32 %v1427_v6, %v260_v29 }
 0x398   :  { %v1103_v31 = vpop.f32.mrf.mxu1 }
 0x399   :  { %v271_v32 = vadd.f32 %v261_v30, %v1429_v8  ;;  %v264_v34 = vadd.f32 %v261_v30, %v188_v33 }
 0x39b   :  { %273 = vrot.lane.b32.xlu1 %v271_v32, %s1332_s13  ;;  %v1022_v35 = vmul.f32 -1.442695, %v264_v34 }
 0x39d   :  { %1197 = vpow2.f32 %v1022_v35 }
 0x3aa   :  { %v1198_v36 = vpop.eup %1197 }
 0x3ab   :  { %v268_v37 = vadd.f32 1.0, %v1198_v36 }
 0x3ad   :  { %1199 = vrcp.f32 %v268_v37 }
 0x3ba   :  { %v1200_v38 = vpop.eup %1199 }
 0x3bb   :  { %v283_v44 = vsub.f32 1.0, %v1200_v38  ;;  %v289_v46 = vmul.f32 %v1200_v38, %v186_v27 }
 0x40d   :  { %v274_v39 = vpop.permute.xlu1 %273 }
 0x40e   :  { %v276_v40 = vmul.f32 %v1200_v38, %v274_v39  ;;  %v500_v39 = vld [vmem:[#allocation2 + $0x20] sm:$0xff] }
 0x410   :  { %278 = vrot.lane.b32.xlu0 %v276_v40, %s1332_s13 }
 0x482   :  { %v279_v41 = vpop.permute.xlu0 %278 }
 0x483   :  { %v281_v42 = vadd.f32 %v279_v41, %v188_v33 }
 0x485   :  { %1201 = vtanh.f32 %v281_v42 }
 0x492   :  { %v1202_v43 = vpop.eup %1201 }
 0x493   :  { %285 = vrot.lane.b32.xlu1 %v1202_v43, %s1333_s2 }
 0x505   :  { %v286_v45 = vpop.permute.xlu1 %285 }
 0x506   :  { %v288_v47 = vmul.f32 %v286_v45, %v283_v44 }
 0x508   :  { %v290_v48 = vadd.f32 %v289_v46, %v288_v47 }
 0x50a   :  { %294 = vrot.lane.b32.xlu0 %v290_v48, %s1333_s2 }
 0x57c   :  { %v295_v49 = vpop.permute.xlu0 %294 }
 0x57d   :  { %1113 = vmatmul.mubr.msk.f32.vlgmr.msra.gmra.mxu0 %vm77_vm1, %v295_v49 }
 0x57e   :  { %1127 = vmatpush3.msra.mxu0 %v1385_v1  ;;  %1134 = vmatprep.mubr.msk.f32.mxu0 %vm1331_vm0, %v1330_v0 }
 0x57f   :  { %1128 = vmatprep.subr.mxu0 %v1330_v0 }
 0x580   :  { %1129 = vmatpush3.msra.mxu0 %v1387_v2 }
 0x581   :  { %1130 = vmatprep.subr.mxu0 %v1330_v0 }
 0x582   :  { %1131 = vmatpush3.msra.mxu0 %v1395_v4 }
 0x583   :  { %1132 = vmatprep.subr.mxu0 %v1330_v0 }
 0x584   :  { %1133 = vmatpush3.msra.mxu0 %v1401_v5 }
 0x585   :  { %1148 = vmatprep.subr.mxu0 %v1330_v0 }
 0x63d   :  { %v364_v50 = vpop.f32.mrf.mxu0 }
 0x63e   :  { %v365_v51 = vadd.f32 %v1427_v6, %v364_v50 }
 0x63f   :  { %v1114_v52 = vpop.f32.mrf.mxu0 }
 0x640   :  { %v375_v53 = vadd.f32 %v365_v51, %v1429_v8  ;;  %v368_v55 = vadd.f32 %v365_v51, %v292_v54 }
 0x642   :  { %377 = vrot.lane.b32.xlu1 %v375_v53, %s1332_s13  ;;  %v1024_v56 = vmul.f32 -1.442695, %v368_v55 }
 0x644   :  { %1203 = vpow2.f32 %v1024_v56 }
 0x651   :  { %v1204_v57 = vpop.eup %1203 }
 0x652   :  { %v372_v58 = vadd.f32 1.0, %v1204_v57 }
 0x654   :  { %1205 = vrcp.f32 %v372_v58 }
 0x661   :  { %v1206_v59 = vpop.eup %1205 }
 0x662   :  { %v387_v7 = vsub.f32 1.0, %v1206_v59  ;;  %v393_v10 = vmul.f32 %v1206_v59, %v290_v48 }
 0x6b4   :  { %v378_v60 = vpop.permute.xlu1 %377 }
 0x6b5   :  { %v380_v61 = vmul.f32 %v1206_v59, %v378_v60  ;;  %v604_v59 = vld [vmem:[#allocation2 + $0x28] sm:$0xff] }
 0x6b7   :  { %382 = vrot.lane.b32.xlu0 %v380_v61, %s1332_s13 }
 0x729   :  { %v383_v62 = vpop.permute.xlu0 %382 }
 0x72a   :  { %v385_v63 = vadd.f32 %v383_v62, %v292_v54 }
 0x72c   :  { %1207 = vtanh.f32 %v385_v63 }
 0x739   :  { %v1208_v3 = vpop.eup %1207 }
 0x73a   :  { %389 = vrot.lane.b32.xlu1 %v1208_v3, %s1333_s2 }
 0x7ac   :  { %v390_v9 = vpop.permute.xlu1 %389 }
 0x7ad   :  { %v392_v11 = vmul.f32 %v390_v9, %v387_v7 }
 0x7af   :  { %v394_v12 = vadd.f32 %v393_v10, %v392_v11 }
 0x7b1   :  { %398 = vrot.lane.b32.xlu0 %v394_v12, %s1333_s2 }
 0x823   :  { %v399_v13 = vpop.permute.xlu0 %398 }
 0x824   :  { %1124 = vmatmul.mubr.msk.f32.vlgmr.msra.gmra.mxu1 %vm77_vm1, %v399_v13 }
 0x825   :  { %1138 = vmatpush3.msra.mxu1 %v1385_v1  ;;  %1145 = vmatprep.mubr.msk.f32.mxu1 %vm1331_vm0, %v1330_v0 }
 0x826   :  { %1139 = vmatprep.subr.mxu1 %v1330_v0 }
 0x827   :  { %1140 = vmatpush3.msra.mxu1 %v1387_v2 }
 0x828   :  { %1141 = vmatprep.subr.mxu1 %v1330_v0 }
 0x829   :  { %1142 = vmatpush3.msra.mxu1 %v1395_v4 }
 0x82a   :  { %1143 = vmatprep.subr.mxu1 %v1330_v0 }
 0x82b   :  { %1144 = vmatpush3.msra.mxu1 %v1401_v5 }
 0x82c   :  { %1159 = vmatprep.subr.mxu1 %v1330_v0 }
 0x8e4   :  { %v468_v14 = vpop.f32.mrf.mxu1 }
 0x8e5   :  { %v469_v15 = vadd.f32 %v1427_v6, %v468_v14 }
 0x8e6   :  { %v1125_v16 = vpop.f32.mrf.mxu1 }
 0x8e7   :  { %v479_v17 = vadd.f32 %v469_v15, %v1429_v8  ;;  %v472_v19 = vadd.f32 %v469_v15, %v396_v18 }
 0x8e9   :  { %481 = vrot.lane.b32.xlu1 %v479_v17, %s1332_s13  ;;  %v1026_v20 = vmul.f32 -1.442695, %v472_v19 }
 0x8eb   :  { %1209 = vpow2.f32 %v1026_v20  ;;  %v708_v20 = vld [vmem:[#allocation2 + $0x30] sm:$0xff] }
 0x8f8   :  { %v1210_v21 = vpop.eup %1209 }
 0x8f9   :  { %v476_v22 = vadd.f32 1.0, %v1210_v21 }
 0x8fb   :  { %1211 = vrcp.f32 %v476_v22 }
 0x908   :  { %v1212_v23 = vpop.eup %1211 }
 0x909   :  { %v491_v29 = vsub.f32 1.0, %v1212_v23  ;;  %v497_v31 = vmul.f32 %v1212_v23, %v394_v12 }
 0x95b   :  { %v482_v24 = vpop.permute.xlu1 %481 }
 0x95c   :  { %v484_v25 = vmul.f32 %v1212_v23, %v482_v24 }
 0x95e   :  { %486 = vrot.lane.b32.xlu0 %v484_v25, %s1332_s13 }
 0x9d0   :  { %v487_v26 = vpop.permute.xlu0 %486 }
 0x9d1   :  { %v489_v27 = vadd.f32 %v487_v26, %v396_v18 }
 0x9d3   :  { %1213 = vtanh.f32 %v489_v27 }
 0x9e0   :  { %v1214_v28 = vpop.eup %1213 }
 0x9e1   :  { %493 = vrot.lane.b32.xlu1 %v1214_v28, %s1333_s2 }
 0xa53   :  { %v494_v30 = vpop.permute.xlu1 %493 }
 0xa54   :  { %v496_v32 = vmul.f32 %v494_v30, %v491_v29 }
 0xa56   :  { %v498_v33 = vadd.f32 %v497_v31, %v496_v32 }
 0xa58   :  { %502 = vrot.lane.b32.xlu0 %v498_v33, %s1333_s2 }
 0xaca   :  { %v503_v34 = vpop.permute.xlu0 %502 }
 0xacb   :  { %1135 = vmatmul.mubr.msk.f32.vlgmr.msra.gmra.mxu0 %vm77_vm1, %v503_v34 }
 0xacc   :  { %1149 = vmatpush3.msra.mxu0 %v1385_v1  ;;  %1156 = vmatprep.mubr.msk.f32.mxu0 %vm1331_vm0, %v1330_v0 }
 0xacd   :  { %1150 = vmatprep.subr.mxu0 %v1330_v0 }
 0xace   :  { %1151 = vmatpush3.msra.mxu0 %v1387_v2 }
 0xacf   :  { %1152 = vmatprep.subr.mxu0 %v1330_v0 }
 0xad0   :  { %1153 = vmatpush3.msra.mxu0 %v1395_v4 }
 0xad1   :  { %1154 = vmatprep.subr.mxu0 %v1330_v0 }
 0xad2   :  { %1155 = vmatpush3.msra.mxu0 %v1401_v5 }
 0xad3   :  { %1170 = vmatprep.subr.mxu0 %v1330_v0 }
 0xb8b   :  { %v572_v35 = vpop.f32.mrf.mxu0 }
 0xb8c   :  { %v573_v36 = vadd.f32 %v1427_v6, %v572_v35 }
 0xb8d   :  { %v1136_v37 = vpop.f32.mrf.mxu0 }
 0xb8e   :  { %v583_v38 = vadd.f32 %v573_v36, %v1429_v8  ;;  %v576_v40 = vadd.f32 %v573_v36, %v500_v39 }
 0xb90   :  { %585 = vrot.lane.b32.xlu1 %v583_v38, %s1332_s13  ;;  %v1028_v41 = vmul.f32 -1.442695, %v576_v40 }
 0xb92   :  { %1215 = vpow2.f32 %v1028_v41  ;;  %v812_v41 = vld [vmem:[#allocation2 + $0x38] sm:$0xff] }
 0xb9f   :  { %v1216_v42 = vpop.eup %1215 }
 0xba0   :  { %v580_v43 = vadd.f32 1.0, %v1216_v42 }
 0xba2   :  { %1217 = vrcp.f32 %v580_v43 }
 0xbaf   :  { %v1218_v44 = vpop.eup %1217 }
 0xbb0   :  { %v595_v50 = vsub.f32 1.0, %v1218_v44  ;;  %v601_v52 = vmul.f32 %v1218_v44, %v498_v33 }
 0xc02   :  { %v586_v45 = vpop.permute.xlu1 %585 }
 0xc03   :  { %v588_v46 = vmul.f32 %v1218_v44, %v586_v45 }
 0xc05   :  { %590 = vrot.lane.b32.xlu0 %v588_v46, %s1332_s13 }
 0xc77   :  { %v591_v47 = vpop.permute.xlu0 %590 }
 0xc78   :  { %v593_v48 = vadd.f32 %v591_v47, %v500_v39 }
 0xc7a   :  { %1219 = vtanh.f32 %v593_v48 }
 0xc87   :  { %v1220_v49 = vpop.eup %1219 }
 0xc88   :  { %597 = vrot.lane.b32.xlu1 %v1220_v49, %s1333_s2 }
 0xcfa   :  { %v598_v51 = vpop.permute.xlu1 %597 }
 0xcfb   :  { %v600_v53 = vmul.f32 %v598_v51, %v595_v50  ;;  %v917_v51 = vld [vmem:[#allocation7 + $0x10] sm:$0xff] }
 0xcfd   :  { %v602_v54 = vadd.f32 %v601_v52, %v600_v53  ;;  %v915_v52 = vld [vmem:[#allocation7] sm:$0xff] }
 0xcff   :  { %606 = vrot.lane.b32.xlu0 %v602_v54, %s1333_s2 }
 0xd71   :  { %v607_v55 = vpop.permute.xlu0 %606 }
 0xd72   :  { %1146 = vmatmul.mubr.msk.f32.vlgmr.msra.gmra.mxu1 %vm77_vm1, %v607_v55 }
 0xd73   :  { %1160 = vmatpush3.msra.mxu1 %v1385_v1  ;;  %1167 = vmatprep.mubr.msk.f32.mxu1 %vm1331_vm0, %v1330_v0 }
 0xd74   :  { %1161 = vmatprep.subr.mxu1 %v1330_v0 }
 0xd75   :  { %1162 = vmatpush3.msra.mxu1 %v1387_v2 }
 0xd76   :  { %1163 = vmatprep.subr.mxu1 %v1330_v0 }
 0xd77   :  { %1164 = vmatpush3.msra.mxu1 %v1395_v4 }
 0xd78   :  { %1165 = vmatprep.subr.mxu1 %v1330_v0 }
 0xd79   :  { %1166 = vmatpush3.msra.mxu1 %v1401_v5 }
 0xe32   :  { %v676_v56 = vpop.f32.mrf.mxu1 }
 0xe33   :  { %v677_v57 = vadd.f32 %v1427_v6, %v676_v56 }
 0xe34   :  { %v1147_v58 = vpop.f32.mrf.mxu1 }
 0xe35   :  { %v687_v1 = vadd.f32 %v677_v57, %v1429_v8  ;;  %v680_v60 = vadd.f32 %v677_v57, %v604_v59 }
 0xe37   :  { %689 = vrot.lane.b32.xlu1 %v687_v1, %s1332_s13  ;;  %v1030_v61 = vmul.f32 -1.442695, %v680_v60 }
 0xe39   :  { %1221 = vpow2.f32 %v1030_v61 }
 0xe46   :  { %v1222_v2 = vpop.eup %1221 }
 0xe47   :  { %v684_v62 = vadd.f32 1.0, %v1222_v2 }
 0xe49   :  { %1223 = vrcp.f32 %v684_v62 }
 0xe56   :  { %v1224_v4 = vpop.eup %1223 }
 0xe57   :  { %v699_v10 = vsub.f32 1.0, %v1224_v4  ;;  %v705_v12 = vmul.f32 %v1224_v4, %v602_v54 }
 0xea9   :  { %v690_v63 = vpop.permute.xlu1 %689 }
 0xeaa   :  { %v692_v3 = vmul.f32 %v1224_v4, %v690_v63 }
 0xeac   :  { %694 = vrot.lane.b32.xlu0 %v692_v3, %s1332_s13 }
 0xf1e   :  { %v695_v5 = vpop.permute.xlu0 %694 }
 0xf1f   :  { %v697_v7 = vadd.f32 %v695_v5, %v604_v59  ;;  %v1035_v59 = vld [vmem:[%s1552_s5] ss:$0 sm:$0xff] }
 0xf21   :  { %1225 = vtanh.f32 %v697_v7 }
 0xf2e   :  { %v1226_v9 = vpop.eup %1225 }
 0xf2f   :  { %701 = vrot.lane.b32.xlu1 %v1226_v9, %s1333_s2 }
 0xfa1   :  { %v702_v11 = vpop.permute.xlu1 %701 }
 0xfa2   :  { %v704_v13 = vmul.f32 %v702_v11, %v699_v10 }
 0xfa4   :  { %v706_v14 = vadd.f32 %v705_v12, %v704_v13 }
 0xfa6   :  { %710 = vrot.lane.b32.xlu0 %v706_v14, %s1333_s2 }
0x1018   :  { %v711_v15 = vpop.permute.xlu0 %710 }
0x1019   :  { %1157 = vmatmul.mubr.msk.f32.vlgmr.msra.gmra.mxu0 %vm77_vm1, %v711_v15 }
0x101a   :  { %1178 = vmatprep.mubr.msk.f32.mxu0 %vm1331_vm0, %v1330_v0 }
0x10d9   :  { %v780_v16 = vpop.f32.mrf.mxu0 }
0x10da   :  { %v781_v17 = vadd.f32 %v1427_v6, %v780_v16 }
0x10db   :  { %v1158_v18 = vpop.f32.mrf.mxu0 }
0x10dc   :  { %v791_v19 = vadd.f32 %v781_v17, %v1429_v8  ;;  %v784_v21 = vadd.f32 %v781_v17, %v708_v20 }
0x10de   :  { %793 = vrot.lane.b32.xlu1 %v791_v19, %s1332_s13  ;;  %v1032_v22 = vmul.f32 -1.442695, %v784_v21 }
0x10e0   :  { %1227 = vpow2.f32 %v1032_v22 }
0x10ed   :  { %v1228_v23 = vpop.eup %1227 }
0x10ee   :  { %v788_v24 = vadd.f32 1.0, %v1228_v23 }
0x10f0   :  { %1229 = vrcp.f32 %v788_v24 }
0x10fd   :  { %v1230_v25 = vpop.eup %1229 }
0x10fe   :  { %v803_v31 = vsub.f32 1.0, %v1230_v25  ;;  %v809_v33 = vmul.f32 %v1230_v25, %v706_v14 }
0x1150   :  { %v794_v26 = vpop.permute.xlu1 %793 }
0x1151   :  { %v796_v27 = vmul.f32 %v1230_v25, %v794_v26 }
0x1153   :  { %798 = vrot.lane.b32.xlu0 %v796_v27, %s1332_s13 }
0x11c5   :  { %v799_v28 = vpop.permute.xlu0 %798 }
0x11c6   :  { %v801_v29 = vadd.f32 %v799_v28, %v708_v20 }
0x11c8   :  { %1231 = vtanh.f32 %v801_v29 }
0x11d5   :  { %v1232_v30 = vpop.eup %1231 }
0x11d6   :  { %805 = vrot.lane.b32.xlu1 %v1232_v30, %s1333_s2 }
0x1248   :  { %v806_v32 = vpop.permute.xlu1 %805 }
0x1249   :  { %v808_v34 = vmul.f32 %v806_v32, %v803_v31 }
0x124b   :  { %v810_v35 = vadd.f32 %v809_v33, %v808_v34 }
0x124d   :  { %814 = vrot.lane.b32.xlu0 %v810_v35, %s1333_s2 }
0x12bf   :  { %v815_v36 = vpop.permute.xlu0 %814 }
0x12c0   :  { %1168 = vmatmul.mubr.msk.f32.vlgmr.msra.gmra.mxu1 %vm77_vm1, %v815_v36 }
0x1380   :  { %v884_v37 = vpop.f32.mrf.mxu1 }
0x1381   :  { %v885_v38 = vadd.f32 %v1427_v6, %v884_v37  ;;  %v918_v6 = vld [vmem:[#allocation7 + $0x18] sm:$0xff] }
0x1382   :  { %v1169_v39 = vpop.f32.mrf.mxu1  ;;  %1171 = vmatpush3.msra.mxu0 %v918_v6 }
0x1383   :  { %v895_v40 = vadd.f32 %v885_v38, %v1429_v8  ;;  %v888_v42 = vadd.f32 %v885_v38, %v812_v41  ;;  %1172 = vmatprep.subr.mxu0 %v1330_v0  ;;  %v916_v8 = vld [vmem:[#allocation7 + $0x8] sm:$0xff] }
0x1384   :  { %1173 = vmatpush3.msra.mxu0 %v917_v51 }
0x1385   :  { %897 = vrot.lane.b32.xlu1 %v895_v40, %s1332_s13  ;;  %v1034_v43 = vmul.f32 -1.442695, %v888_v42  ;;  %1174 = vmatprep.subr.mxu0 %v1330_v0 }
0x1386   :  { %1175 = vmatpush3.msra.mxu0 %v916_v8 }
0x1387   :  { %1233 = vpow2.f32 %v1034_v43  ;;  %1176 = vmatprep.subr.mxu0 %v1330_v0 }
0x1388   :  { %1177 = vmatpush3.msra.mxu0 %v915_v52 }
0x1394   :  { %v1234_v44 = vpop.eup %1233 }
0x1395   :  { %v892_v45 = vadd.f32 1.0, %v1234_v44 }
0x1397   :  { %1235 = vrcp.f32 %v892_v45 }
0x13a4   :  { %v1236_v46 = vpop.eup %1235 }
0x13a5   :  { %v907_v54 = vsub.f32 1.0, %v1236_v46  ;;  %v913_v56 = vmul.f32 %v1236_v46, %v810_v35 }
0x13f7   :  { %v898_v47 = vpop.permute.xlu1 %897 }
0x13f8   :  { %v900_v48 = vmul.f32 %v1236_v46, %v898_v47 }
0x13fa   :  { %902 = vrot.lane.b32.xlu0 %v900_v48, %s1332_s13 }
0x146c   :  { %v903_v49 = vpop.permute.xlu0 %902 }
0x146d   :  { %v905_v50 = vadd.f32 %v903_v49, %v812_v41 }
0x146f   :  { %1237 = vtanh.f32 %v905_v50 }
0x147c   :  { %v1238_v53 = vpop.eup %1237 }
0x147d   :  { %909 = vrot.lane.b32.xlu1 %v1238_v53, %s1333_s2 }
0x14ef   :  { %v910_v55 = vpop.permute.xlu1 %909 }
0x14f0   :  { %v912_v57 = vmul.f32 %v910_v55, %v907_v54 }
0x14f2   :  { %v914_v58 = vadd.f32 %v913_v56, %v912_v57 }
0x14f4   :  { %927 = vrot.lane.b32.xlu0 %v914_v58, %s1333_s2 }
0x1566   :  { %v928_v1 = vpop.permute.xlu0 %927 }
0x1567   :  { %1179 = vmatmul.mubr.msk.f32.vlgmr.msra.gmra.mxu0 %vm77_vm1, %v928_v1 }
0x1627   :  { %v997_v0 = vpop.f32.mrf.mxu0 }
0x1628   :  { %v998_v60 = vadd.f32 %v1035_v59, %v997_v0 }
0x1629   :  { %v1180_v61 = vpop.f32.mrf.mxu0 }
0x162a   :  { %1001 = vst [vmem:[#allocation8] sm:$0xff] %v998_v60 }
0x162b   :  { %1310 = shalt.err (!%p1307_p5)
}
0x162c   :  { %1011 = dma.vmem_to_hbm [thread:$0]  %s1009_s18, 128, %s1553_s6, [#allocation4]  }
0x162d   :  { %1323 = dma.done.wait [#allocation4], 128  }
0x162e   :  { %1324 = vsyncadd [#allocation4], 4294967168 }
0x162f   :  { %1015 = vsyncpa [#allocation3], 1 }
0x1630   :  { %1016 = vsyncpa [#allocation6], 1 }
0x1631   :  { %1017 = vsyncpa [#allocation4], 1 }

</bundles_post_ra>
